<compile_context>
chip_gen: v7x
topology: tpu7x:2x2x1
jax: 0.10.0
libtpu: 0.0.40
codegen_flags: <defaults>
</compile_context>

<pallas_src>
import functools

import jax
import jax.numpy as jnp
from jax import lax
from jax.experimental import pallas as pl
from jax.experimental.pallas import tpu as pltpu


def _round_up(x, m):
    return (x + m - 1) // m * m


# --------------------------------------------------------------------------
# Pallas kernel: fused softmax + Dice reductions for one (batch, spatial-tile)
# --------------------------------------------------------------------------
def _dice_kernel(x_ref, t_ref, o_ref, acc_i_ref, acc_d_ref, *,
                 smooth, s_true, ts, need_mask):
    s = pl.program_id(1)
    ns = pl.num_programs(1)

    @pl.when(s == 0)
    def _init():
        acc_i_ref[...] = jnp.zeros_like(acc_i_ref)
        acc_d_ref[...] = jnp.zeros_like(acc_d_ref)

    # Read native-dtype tiles and widen in-register (no f32 copies in HBM).
    x = x_ref[...].astype(jnp.float32)           # (1, C, ts) logits
    t = t_ref[...].astype(jnp.float32)           # (1, C, ts) target

    # Numerically stable softmax numerator over the channel axis (axis=1).
    # The division by Z is factored out: channel sums are taken on the
    # exponentials and divided once per column.
    m = jnp.max(x, axis=1, keepdims=True)
    e = jnp.exp(x - m)                           # e <= 1

    z = jnp.sum(e, axis=1)                       # (1, ts)  softmax denominator
    s_et = jnp.sum(e * t, axis=1)                # (1, ts)  sum_c e_c * t_c
    s_e2 = jnp.sum(e * e, axis=1)                # (1, ts)  sum_c e_c^2
    s_t2 = jnp.sum(t * t, axis=1)                # (1, ts)  sum_c t_c^2

    inv_z = pl.reciprocal(z, approx=False)       # one divide per column
    col_i = s_et * inv_z                         # sum_c p_c * t_c
    col_d = s_e2 * inv_z * inv_z + s_t2          # sum_c (p_c^2 + t_c^2)

    if need_mask:
        # Ragged last tile: the overhanging block contents are undefined, but
        # every op above is column-local, so masking only the per-column
        # contributions is sufficient (and cheap: 2 selects per column).
        col = s * ts + lax.broadcasted_iota(jnp.int32, (1, ts), 1)
        valid = col < s_true
        col_i = jnp.where(valid, col_i, 0.0)
        col_d = jnp.where(valid, col_d, 0.0)

    # Lane-wise partial sums; the cross-lane reduce is deferred to finalize.
    acc_i_ref[...] += col_i
    acc_d_ref[...] += col_d

    @pl.when(s == ns - 1)
    def _finalize():
        inter = jnp.sum(acc_i_ref[...]) + smooth
        den = jnp.sum(acc_d_ref[...]) + smooth
        o_ref[...] = jnp.full(o_ref.shape, 1.0 - 2.0 * (inter / den), jnp.float32)


# --------------------------------------------------------------------------
# Wrapper
# --------------------------------------------------------------------------
def dice_loss(model_out, target, smooth=1.0, max_lane_tile=16384):
    """Dice loss, matching the PyTorch DiceLoss.forward semantics."""
    assert model_out.shape == target.shape, (model_out.shape, target.shape)
    B, C = model_out.shape[0], model_out.shape[1]
    S = 1
    for d in model_out.shape[2:]:
        S *= d

    # Free reshape to (B, C, S): lanes = spatial, sublanes = channels.
    # Inputs stay in their native dtype (no HBM-side f32 materialization).
    x = model_out.reshape(B, C, S)
    t = target.reshape(B, C, S)

    # Spatial tile: lane-aligned (multiple of 128).  Cap so the f32 view of one
    # input block stays ~1 MiB and the 8x sublane-padded (1, ts) accumulators
    # stay ~0.5 MiB each -> comfortable under v5e 16 MiB / v7x 32 MiB defaults.
    lane_s = _round_up(S, 128)
    cap_from_block = max(128, ((256 * 1024) // max(C, 1)) // 128 * 128)
    ts = min(lane_s, min(cap_from_block, max_lane_tile))
    ns = pl.cdiv(S, ts)
    need_mask = (S % ts) != 0

    kernel = functools.partial(
        _dice_kernel, smooth=float(smooth), s_true=S, ts=ts, need_mask=need_mask)

    in_bytes = x.size * x.dtype.itemsize + t.size * t.dtype.itemsize
    cost = pl.CostEstimate(
        flops=8 * B * C * S,
        transcendentals=B * C * S,
        bytes_accessed=in_bytes + B * 8 * 128 * 4)

    per_batch = pl.pallas_call(
        kernel,
        out_shape=jax.ShapeDtypeStruct((B, 8, 128), jnp.float32),
        grid=(B, ns),
        in_specs=[
            pl.BlockSpec((1, C, ts), lambda b, s: (b, 0, s)),
            pl.BlockSpec((1, C, ts), lambda b, s: (b, 0, s)),
        ],
        out_specs=pl.BlockSpec((1, 8, 128), lambda b, s: (b, 0, 0)),
        scratch_shapes=[
            pltpu.VMEM((1, ts), jnp.float32),   # Σ p·t partials (per lane)
            pltpu.VMEM((1, ts), jnp.float32),   # Σ (p²+t²) partials (per lane)
        ],
        compiler_params=pltpu.CompilerParams(
            dimension_semantics=("parallel", "arbitrary")),
        cost_estimate=cost,
    )(x, t)

    # Final mean over batch: (B,) elements, trivial -> plain JAX.
    return jnp.mean(per_batch[:, 0, 0])


# --------------------------------------------------------------------------
# Pure-JAX reference (for correctness check)
# --------------------------------------------------------------------------
def dice_loss_ref(model_out, target, smooth=1.0):
    p = jax.nn.softmax(model_out.astype(jnp.float32), axis=1)
    B = model_out.shape[0]
    p = p.reshape(B, -1)
    t = target.astype(jnp.float32).reshape(B, -1)
    intersect = jnp.sum(p * t, axis=1) + smooth
    den = jnp.sum(p * p + t * t, axis=1) + smooth
    return jnp.mean(1.0 - 2.0 * (intersect / den))


if __name__ == "__main__":
    key = jax.random.PRNGKey(0)
    k1, k2, k3, k4 = jax.random.split(key, 4)

    # Test 1: lane-aligned spatial size (no masking path).
    B, C, H, W = 2, 4, 16, 16
    model_out = jax.random.normal(k1, (B, C, H, W), jnp.float32)
    labels = jax.random.randint(k2, (B, H, W), 0, C)
    target = jax.nn.one_hot(labels, C, axis=1, dtype=jnp.float32)  # (B, C, H, W)

    loss = jax.block_until_ready(jax.jit(dice_loss)(model_out, target))
    ref = dice_loss_ref(model_out, target)
    assert loss.shape == (), loss.shape
    assert bool(jnp.isfinite(loss))
    assert bool(jnp.allclose(loss, ref, rtol=1e-5, atol=1e-5)), (loss, ref)

    # Test 2: ragged spatial size + multi-tile reduction (exercises in-kernel
    # masking of the overhanging last tile, no HBM padding copies).
    B2, C2, H2, W2 = 2, 3, 16, 20          # S = 320, tile = 128 -> 3 tiles
    x2 = jax.random.normal(k3, (B2, C2, H2, W2), jnp.float32)
    lab2 = jax.random.randint(k4, (B2, H2, W2), 0, C2)
    t2 = jax.nn.one_hot(lab2, C2, axis=1, dtype=jnp.float32)

    loss2 = jax.block_until_ready(
        jax.jit(functools.partial(dice_loss, max_lane_tile=128))(x2, t2))
    ref2 = dice_loss_ref(x2, t2)
    assert bool(jnp.isfinite(loss2))
    assert bool(jnp.allclose(loss2, ref2, rtol=1e-5, atol=1e-5)), (loss2, ref2)

    print("KERNEL_OK")
</pallas_src>

<mosaic_0001>
module attributes {stable_mosaic.version = 11 : i64} {
  func.func @_dice_kernel(%arg0: i32, %arg1: i32, %arg2: memref<1x4x256xf32, #tpu.memory_space<vmem>>, %arg3: memref<1x4x256xf32, #tpu.memory_space<vmem>>, %arg4: memref<1x8x128xf32, #tpu.memory_space<vmem>>, %arg5: memref<1x256xf32, #tpu.memory_space<vmem>>, %arg6: memref<1x256xf32, #tpu.memory_space<vmem>>) attributes {dimension_semantics = [#tpu.dimension_semantics<parallel>, #tpu.dimension_semantics<arbitrary>], iteration_bounds = array<i64: 2, 1>, scalar_prefetch = 0 : i64, scratch_operands = 2 : i64, tpu.core_type = #tpu.core_type<tc>, window_params = [{transform_indices = @transform_0, window_bounds = array<i64: 1, 4, 256>}, {transform_indices = @transform_1, window_bounds = array<i64: 1, 4, 256>}, {transform_indices = @transform_2, window_bounds = array<i64: 1, 8, 128>}]} {
    %c0_i32 = arith.constant 0 : i32
    %0 = arith.cmpi eq, %arg1, %c0_i32 : i32
    %1 = arith.extui %0 : i1 to i32
    %c0_i32_0 = arith.constant 0 : i32
    %2 = arith.cmpi ne, %1, %c0_i32_0 : i32
    scf.if %2 {
      %cst_20 = arith.constant 0.000000e+00 : f32
      %31 = vector.broadcast %cst_20 : f32 to vector<1x256xf32>
      %c0_21 = arith.constant 0 : index
      %c0_22 = arith.constant 0 : index
      %32 = vector.load %arg5[%c0_21, %c0_22] : memref<1x256xf32, #tpu.memory_space<vmem>>, vector<1x256xf32>
      tpu.vector_store %arg5[%c0_21, %c0_22], %31 {strides = array<i32>} : memref<1x256xf32, #tpu.memory_space<vmem>>, vector<1x256xf32>,
      %cst_23 = arith.constant 0.000000e+00 : f32
      %33 = vector.broadcast %cst_23 : f32 to vector<1x256xf32>
      %c0_24 = arith.constant 0 : index
      %c0_25 = arith.constant 0 : index
      %34 = vector.load %arg6[%c0_24, %c0_25] : memref<1x256xf32, #tpu.memory_space<vmem>>, vector<1x256xf32>
      tpu.vector_store %arg6[%c0_24, %c0_25], %33 {strides = array<i32>} : memref<1x256xf32, #tpu.memory_space<vmem>>, vector<1x256xf32>,
    } else {
    }
    %c0 = arith.constant 0 : index
    %c0_1 = arith.constant 0 : index
    %c0_2 = arith.constant 0 : index
    %3 = vector.load %arg2[%c0, %c0_1, %c0_2] : memref<1x4x256xf32, #tpu.memory_space<vmem>>, vector<1x4x256xf32>
    %c0_3 = arith.constant 0 : index
    %c0_4 = arith.constant 0 : index
    %c0_5 = arith.constant 0 : index
    %4 = vector.load %arg3[%c0_3, %c0_4, %c0_5] : memref<1x4x256xf32, #tpu.memory_space<vmem>>, vector<1x4x256xf32>
    %cst = arith.constant dense<0xFF800000> : vector<1x256xf32>
    %5 = vector.multi_reduction <maximumf>, %3, %cst [1] : vector<1x4x256xf32> to vector<1x256xf32>
    %6 = vector.shape_cast %5 : vector<1x256xf32> to vector<1x1x256xf32>
    %7 = vector.broadcast %6 : vector<1x1x256xf32> to vector<1x4x256xf32>
    %8 = arith.subf %3, %7 : vector<1x4x256xf32>
    %9 = math.exp %8 : vector<1x4x256xf32>
    %cst_6 = arith.constant dense<0.000000e+00> : vector<1x256xf32>
    %10 = vector.multi_reduction <add>, %9, %cst_6 [1] : vector<1x4x256xf32> to vector<1x256xf32>
    %11 = arith.mulf %9, %4 : vector<1x4x256xf32>
    %cst_7 = arith.constant dense<0.000000e+00> : vector<1x256xf32>
    %12 = vector.multi_reduction <add>, %11, %cst_7 [1] : vector<1x4x256xf32> to vector<1x256xf32>
    %13 = arith.mulf %9, %9 : vector<1x4x256xf32>
    %cst_8 = arith.constant dense<0.000000e+00> : vector<1x256xf32>
    %14 = vector.multi_reduction <add>, %13, %cst_8 [1] : vector<1x4x256xf32> to vector<1x256xf32>
    %15 = arith.mulf %4, %4 : vector<1x4x256xf32>
    %cst_9 = arith.constant dense<0.000000e+00> : vector<1x256xf32>
    %16 = vector.multi_reduction <add>, %15, %cst_9 [1] : vector<1x4x256xf32> to vector<1x256xf32>
    %17 = tpu.reciprocal %10 : vector<1x256xf32> -> vector<1x256xf32>
    %18 = arith.mulf %12, %17 : vector<1x256xf32>
    %19 = arith.mulf %14, %17 : vector<1x256xf32>
    %20 = arith.mulf %19, %17 : vector<1x256xf32>
    %21 = arith.addf %20, %16 : vector<1x256xf32>
    %c0_10 = arith.constant 0 : index
    %c0_11 = arith.constant 0 : index
    %22 = vector.load %arg5[%c0_10, %c0_11] : memref<1x256xf32, #tpu.memory_space<vmem>>, vector<1x256xf32>
    %23 = arith.addf %22, %18 : vector<1x256xf32>
    %c0_12 = arith.constant 0 : index
    %c0_13 = arith.constant 0 : index
    %24 = vector.load %arg5[%c0_12, %c0_13] : memref<1x256xf32, #tpu.memory_space<vmem>>, vector<1x256xf32>
    tpu.vector_store %arg5[%c0_12, %c0_13], %23 {strides = array<i32>} : memref<1x256xf32, #tpu.memory_space<vmem>>, vector<1x256xf32>,
    %c0_14 = arith.constant 0 : index
    %c0_15 = arith.constant 0 : index
    %25 = vector.load %arg6[%c0_14, %c0_15] : memref<1x256xf32, #tpu.memory_space<vmem>>, vector<1x256xf32>
    %26 = arith.addf %25, %21 : vector<1x256xf32>
    %c0_16 = arith.constant 0 : index
    %c0_17 = arith.constant 0 : index
    %27 = vector.load %arg6[%c0_16, %c0_17] : memref<1x256xf32, #tpu.memory_space<vmem>>, vector<1x256xf32>
    tpu.vector_store %arg6[%c0_16, %c0_17], %26 {strides = array<i32>} : memref<1x256xf32, #tpu.memory_space<vmem>>, vector<1x256xf32>,
    %c0_i32_18 = arith.constant 0 : i32
    %28 = arith.cmpi eq, %arg1, %c0_i32_18 : i32
    %29 = arith.extui %28 : i1 to i32
    %c0_i32_19 = arith.constant 0 : i32
    %30 = arith.cmpi ne, %29, %c0_i32_19 : i32
    scf.if %30 {
      %c0_20 = arith.constant 0 : index
      %c0_21 = arith.constant 0 : index
      %31 = vector.load %arg5[%c0_20, %c0_21] : memref<1x256xf32, #tpu.memory_space<vmem>>, vector<1x256xf32>
      %32 = vector.shape_cast %31 : vector<1x256xf32> to vector<1x1x256xf32>
      %cst_22 = arith.constant dense<0.000000e+00> : vector<1xf32>
      %33 = vector.multi_reduction <add>, %32, %cst_22 [1, 2] : vector<1x1x256xf32> to vector<1xf32>
      %34 = vector.shape_cast %33 : vector<1xf32> to vector<1x1x1xf32>
      %35 = vector.extract %34[0, 0, 0] : f32 from vector<1x1x1xf32>
      %cst_23 = arith.constant 1.000000e+00 : f32
      %36 = arith.addf %35, %cst_23 : f32
      %c0_24 = arith.constant 0 : index
      %c0_25 = arith.constant 0 : index
      %37 = vector.load %arg6[%c0_24, %c0_25] : memref<1x256xf32, #tpu.memory_space<vmem>>, vector<1x256xf32>
      %38 = vector.shape_cast %37 : vector<1x256xf32> to vector<1x1x256xf32>
      %cst_26 = arith.constant dense<0.000000e+00> : vector<1xf32>
      %39 = vector.multi_reduction <add>, %38, %cst_26 [1, 2] : vector<1x1x256xf32> to vector<1xf32>
      %40 = vector.shape_cast %39 : vector<1xf32> to vector<1x1x1xf32>
      %41 = vector.extract %40[0, 0, 0] : f32 from vector<1x1x1xf32>
      %cst_27 = arith.constant 1.000000e+00 : f32
      %42 = arith.addf %41, %cst_27 : f32
      %43 = arith.divf %36, %42 : f32
      %cst_28 = arith.constant 2.000000e+00 : f32
      %44 = arith.mulf %cst_28, %43 : f32
      %cst_29 = arith.constant 1.000000e+00 : f32
      %45 = arith.subf %cst_29, %44 : f32
      %46 = vector.broadcast %45 : f32 to vector<1x8x128xf32>
      %c0_30 = arith.constant 0 : index
      %c0_31 = arith.constant 0 : index
      %c0_32 = arith.constant 0 : index
      %47 = vector.load %arg4[%c0_30, %c0_31, %c0_32] : memref<1x8x128xf32, #tpu.memory_space<vmem>>, vector<1x8x128xf32>
      tpu.vector_store %arg4[%c0_30, %c0_31, %c0_32], %46 {strides = array<i32>} : memref<1x8x128xf32, #tpu.memory_space<vmem>>, vector<1x8x128xf32>,
    } else {
    }
    return
  }
  func.func @transform_0(%arg0: i32, %arg1: i32) -> (i32, i32, i32) {
    %c0_i32 = arith.constant 0 : i32
    %c0_i32_0 = arith.constant 0 : i32
    return %arg0, %c0_i32, %arg1 : i32, i32, i32
  }
  func.func @transform_1(%arg0: i32, %arg1: i32) -> (i32, i32, i32) {
    %c0_i32 = arith.constant 0 : i32
    %c0_i32_0 = arith.constant 0 : i32
    return %arg0, %c0_i32, %arg1 : i32, i32, i32
  }
  func.func @transform_2(%arg0: i32, %arg1: i32) -> (i32, i32, i32) {
    %c0_i32 = arith.constant 0 : i32
    %c0_i32_0 = arith.constant 0 : i32
    %c0_i32_1 = arith.constant 0 : i32
    return %arg0, %c0_i32, %c0_i32_0 : i32, i32, i32
  }
}

</mosaic_0001>

<bundles_post_ra>
// kernel: dice_loss.1
= control target key start
LH: loop header
LB: loop body
LE: loop exit
PB: predicated region body
PF: predicated region fallthrough
CT: control target
= control target key end

     0   :  { %s613_s9 = smov 0   ;;  %s615_s10 = smov 0   ;;  %s678_s0 = inlined_call_operand.vmem [shape: f32[2,4,256], index: 0, kind: input, shape index: {}]   ;;  %s679_s1 = inlined_call_operand.vmem [shape: f32[2,4,256], index: 1, kind: input, shape index: {}]   ;;  %s680_s2 = inlined_call_operand.vmem [shape: f32[2,8,128], index: 2, kind: output, shape index: {}]  }
   0x1   :  { %s617_s11 = smov 0  }
   0x2 LB: > { %s24_s12 = sadd.s32 1, %s590_s10  ;;  %p521_p0 = scmp.ge.s32.totalorder %s594_s11, 1  ;;  %s594_s11 = sphi %s617_s11, %s12_s11   ;;  %s590_s10 = sphi %s615_s10, %s684_s10   ;;  %s586_s9 = sphi %s613_s9, %s683_s9  }
   0x3   : > { %p26_p1 = scmp.ge.s32.totalorder %s24_s12, 2  ;;  %p148_p2 = scmp.lt.s32.totalorder %s594_s11, 3 }
   0x5   : > { %s686_s12 = smov (%p26_p1, %s24_s12), 0  ;;  %p149_p3 = pnand %p521_p0, %p148_p2 }
   0x6   : > { %p183_p4 = scmp.lt.s32.totalorder (!%p149_p3), %s586_s9, 1  ;;  %v210_v0 = vlaneseq (!%p149_p3)  ;;  %v596_v2 = vmov (!%p149_p3), 0.0   ;;  %vm221_vm1 = vcmask (!%p149_p3), 1043456   ;;  %vm385_vm2 = vcmask (!%p149_p3), 1040384  }
   0x7   : > { %152 = sbr.rel (%p149_p3) target bundleno = 379 (0x17b), region = 28 }
   0x8   : > { %vm632_vm0 = vcmp.lt.s32.totalorder (!%p149_p3), %v210_v0, 256 }
   0x9   : > { %214 = vst.msk [vmem:[#allocation2] sm:$0x3] (!%p149_p3), %vm632_vm0, %v596_v2  ;;  %215 = vst.msk [vmem:[#allocation3] sm:$0x3] (!%p149_p3), %vm632_vm0, %v596_v2 }
   0xe   : > { %s688_s9 = smov (!%p183_p4, %s586_s9), 1 }
   0xf   : > { %s640_s13 = sshll.u32 %s688_s9, 3 }
  0x10   : > { %s190_s16 = scalar_lea.vmem %s678_s0, %s640_s13  ;;  %s200_s19 = scalar_lea.vmem %s679_s1, %s640_s13 }
  0x11   : > { %v216_v3 = vld [vmem:[%s190_s16] sm:$0xff]  ;;  %s205_s29 = scalar_lea.vmem %s680_s2, %s640_s13 }
  0x12   : > { %v219_v4 = vcombine.high %v216_v3, %v216_v3  ;;  %v222_v5 = vsel %vm221_vm1, %v216_v3, -inf  ;;  %v217_v22 = vld [vmem:[%s200_s19] sm:$0xff] }
  0x13   : > { %v223_v6 = vrot.slane %v222_v5, 4  ;;  %v296_v23 = vmul.f32 %v217_v22, %v217_v22 }
  0x14   : > { %v229_v7 = vsel %vm221_vm1, %v219_v4, -inf }
  0x15   : > { %v224_v8 = vmax.f32 %v222_v5, %v223_v6  ;;  %v230_v9 = vrot.slane %v229_v7, 4  ;;  %v298_v24 = vcombine.high %v296_v23, %v296_v23  ;;  %v300_v31 = vsel %vm221_vm1, %v296_v23, 0.0 }
  0x16   : > { %v301_v44 = vrot.slane %v300_v31, 4  ;;  %v332_v23 = vshrl.u32 %v210_v0, 7 }
  0x17   : > { %v225_v10 = vrot.slane %v224_v8, 2  ;;  %v231_v11 = vmax.f32 %v229_v7, %v230_v9  ;;  %v307_v32 = vsel %vm221_vm1, %v298_v24, 0.0 }
  0x18   : > { %v308_v51 = vrot.slane %v307_v32, 4  ;;  %v302_v58 = vadd.f32 %v301_v44, %v300_v31 }
  0x19   : > { %v226_v12 = vmax.f32 %v224_v8, %v225_v10  ;;  %v232_v13 = vrot.slane %v231_v11, 2 }
  0x1a   : > { %v309_v63 = vadd.f32 %v308_v51, %v307_v32  ;;  %v303_v6 = vrot.slane %v302_v58, 2 }
  0x1b   : > { %v227_v14 = vrot.slane %v226_v12, 1  ;;  %v233_v15 = vmax.f32 %v231_v11, %v232_v13 }
  0x1c   : > { %v310_v10 = vrot.slane %v309_v63, 2  ;;  %v304_v13 = vadd.f32 %v303_v6, %v302_v58 }
  0x1d   : > { %v228_v16 = vmax.f32 %v226_v12, %v227_v14  ;;  %v234_v17 = vrot.slane %v233_v15, 1  ;;  %v597_v14 = vmov 1966171168  }
  0x1f   : > { %v235_v18 = vmax.f32 %v233_v15, %v234_v17  ;;  %v329_v15 = vunpack.c.l.s4 %v597_v14 }
  0x21   : > { %v238_v19 = vcombine.low %v228_v16, %v235_v18  ;;  %v311_v18 = vadd.f32 %v310_v10, %v309_v63 }
  0x23   : > { %v240_v20 = vsub.f32 %v216_v3, %v238_v19 }
  0x25   : > { %v241_v21 = vmul.f32 1.442695, %v240_v20 }
  0x27   : > { %564 = vpow2.f32 %v241_v21  ;;  %v305_v21 = vrot.slane %v304_v13, 1 }
  0x31   : > { %v565_v25 = vpop.eup %564 }
  0x32   : > { %v244_v26 = vcombine.high %v565_v25, %v565_v25  ;;  %v246_v27 = vsel %vm221_vm1, %v565_v25, 0.0  ;;  %v260_v28 = vmul.f32 %v565_v25, %v217_v22  ;;  %v278_v29 = vmul.f32 %v565_v25, %v565_v25 }
  0x33   : > { %v247_v30 = vrot.slane %v246_v27, 4  ;;  %v330_v22 = vunpack.c.0.s8 %v329_v15 }
  0x34   : > { %v253_v33 = vsel %vm221_vm1, %v244_v26, 0.0  ;;  %v262_v34 = vcombine.high %v260_v28, %v260_v28  ;;  %v264_v35 = vsel %vm221_vm1, %v260_v28, 0.0  ;;  %v280_v36 = vcombine.high %v278_v29, %v278_v29 }
  0x35   : > { %v248_v37 = vadd.f32 %v247_v30, %v246_v27  ;;  %v254_v38 = vrot.slane %v253_v33, 4  ;;  %v265_v39 = vrot.slane %v264_v35, 4  ;;  %v282_v40 = vsel %vm221_vm1, %v278_v29, 0.0 }
  0x36   : > { %v271_v41 = vsel %vm221_vm1, %v262_v34, 0.0  ;;  %v283_v42 = vrot.slane %v282_v40, 4  ;;  %v289_v43 = vsel %vm221_vm1, %v280_v36, 0.0  ;;  %v312_v26 = vrot.slane %v311_v18, 1 }
  0x37   : > { %v249_v45 = vrot.slane %v248_v37, 2  ;;  %v255_v46 = vadd.f32 %v254_v38, %v253_v33  ;;  %v266_v47 = vadd.f32 %v265_v39, %v264_v35  ;;  %v272_v48 = vrot.slane %v271_v41, 4 }
  0x38   : > { %v284_v49 = vadd.f32 %v283_v42, %v282_v40  ;;  %v290_v50 = vrot.slane %v289_v43, 4  ;;  %v306_v28 = vadd.f32 %v305_v21, %v304_v13  ;;  %v333_v32 = vsub.s32 %v330_v22, %v332_v23  ;;  %v324_v42 = vld [vmem:[#allocation2] sm:$0x3] }
  0x39   : > { %v250_v52 = vadd.f32 %v249_v45, %v248_v37  ;;  %v256_v53 = vrot.slane %v255_v46, 2  ;;  %v273_v54 = vadd.f32 %v272_v48, %v271_v41  ;;  %v267_v55 = vrot.slane %v266_v47, 2 }
  0x3a   : > { %v285_v56 = vrot.slane %v284_v49, 2  ;;  %v291_v57 = vadd.f32 %v290_v50, %v289_v43  ;;  %v313_v33 = vadd.f32 %v312_v26, %v311_v18  ;;  %v381_v50 = vsub.s32 1, %v332_v23 }
  0x3b   : > { %v251_v59 = vrot.slane %v250_v52, 1  ;;  %v257_v60 = vadd.f32 %v256_v53, %v255_v46  ;;  %v274_v61 = vrot.slane %v273_v54, 2  ;;  %v268_v4 = vadd.f32 %v267_v55, %v266_v47  ;;  %v349_v46 = vld [vmem:[#allocation3] sm:$0x3] }
  0x3c   : > { %v292_v62 = vrot.slane %v291_v57, 2  ;;  %v286_v5 = vadd.f32 %v285_v56, %v284_v49  ;;  %v377_v49 = vsub.s32 0, %v332_v23 }
  0x3d   : > { %v252_v2 = vadd.f32 %v251_v59, %v250_v52  ;;  %v258_v3 = vrot.slane %v257_v60, 1  ;;  %v275_v8 = vadd.f32 %v274_v61, %v273_v54  ;;  %v269_v11 = vrot.slane %v268_v4, 1 }
  0x3e   : > { %v293_v9 = vadd.f32 %v292_v62, %v291_v57  ;;  %v287_v12 = vrot.slane %v286_v5, 1 }
  0x3f   : > { %v259_v7 = vadd.f32 %v258_v3, %v257_v60  ;;  %566 = vrcp.f32 %v252_v2  ;;  %v276_v16 = vrot.slane %v275_v8, 1  ;;  %v270_v19 = vadd.f32 %v269_v11, %v268_v4 }
  0x40   : > { %v294_v17 = vrot.slane %v293_v9, 1  ;;  %v288_v20 = vadd.f32 %v287_v12, %v286_v5 }
  0x41   : > { %568 = vrcp.f32 %v259_v7  ;;  %v277_v24 = vadd.f32 %v276_v16, %v275_v8 }
  0x42   : > { %v295_v25 = vadd.f32 %v294_v17, %v293_v9 }
  0x49   : > { %v567_v27 = vpop.eup %566 }
  0x4a   : > { %v316_v29 = vmul.f32 %v567_v27, %v270_v19  ;;  %v318_v30 = vmul.f32 %v567_v27, %v288_v20 }
  0x4b   : > { %v569_v31 = vpop.eup %568 }
  0x4c   : > { %v317_v34 = vmul.f32 %v569_v31, %v277_v24  ;;  %v319_v35 = vmul.f32 %v569_v31, %v295_v25  ;;  %v320_v36 = vmul.f32 %v567_v27, %v318_v30 }
  0x4e   : > { %v321_v37 = vmul.f32 %v569_v31, %v319_v35  ;;  %v322_v38 = vadd.f32 %v320_v36, %v306_v28  ;;  %v327_v39 = vcombine.low %v316_v29, %v317_v34 }
  0x50   : > { %v323_v40 = vadd.f32 %v321_v37, %v313_v33  ;;  %v334_v41 = vrot.slane %v327_v39, %v333_v32 }
  0x52   : > { %v341_v0 = vrot.slane %v334_v41, %v333_v32  ;;  %v352_v43 = vcombine.low %v322_v38, %v323_v40 }
  0x54   : > { %v343_v44 = vadd.f32 %v341_v0, %v324_v42  ;;  %v359_v45 = vrot.slane %v352_v43, %v333_v32 }
  0x56   : > { %348 = vst.msk [vmem:[#allocation2] sm:$0x3] %vm632_vm0, %v343_v44  ;;  %v366_v47 = vrot.slane %v359_v45, %v333_v32 }
  0x58   : > { %v368_v48 = vadd.f32 %v366_v47, %v349_v46 }
  0x5a   : > { %369 = vst.msk [vmem:[#allocation3] sm:$0x3] %vm632_vm0, %v368_v48 }
  0x5d   : > { %v373_v51 = vld [vmem:[#allocation2] sm:$0x3] }
  0x5e   : > { %v378_v52 = vrot.slane %v373_v51, %v377_v49  ;;  %v382_v53 = vrot.slane %v373_v51, %v381_v50 }
  0x60   : > { %v386_v54 = vsel %vm385_vm2, %v378_v52, 0.0  ;;  %v387_v55 = vsel %vm385_vm2, %v382_v53, 0.0 }
  0x61   : > { %v388_v56 = vadd.f32 %v387_v55, %v386_v54  ;;  %v399_v57 = vld [vmem:[#allocation3] sm:$0x3] }
  0x62   : > { %v404_v58 = vrot.slane %v399_v57, %v377_v49  ;;  %v408_v59 = vrot.slane %v399_v57, %v381_v50 }
  0x63   : > { %389 = vadd.xlane.f32.xlu0 %v388_v56 }
  0x64   : > { %v411_v60 = vsel %vm385_vm2, %v404_v58, 0.0  ;;  %v412_v61 = vsel %vm385_vm2, %v408_v59, 0.0 }
  0x65   : > { %v413_v62 = vadd.f32 %v412_v61, %v411_v60 }
  0x67   : > { %414 = vadd.xlane.f32.xlu0 %v413_v62 }
  0xf0   : > { %v390_v63 = vpop.xlane.xlu0 %389 }
  0xf1   : > { %v391_v1 = vrot.slane %v390_v63, 4 }
  0xf3   : > { %v392_v2 = vadd.f32 %v391_v1, %v390_v63 }
  0xf4   : > { %v415_v3 = vpop.xlane.xlu0 %414 }
  0xf5   : > { %v393_v4 = vrot.slane %v392_v2, 2  ;;  %v416_v5 = vrot.slane %v415_v3, 4 }
  0xf7   : > { %v417_v6 = vadd.f32 %v416_v5, %v415_v3  ;;  %v394_v7 = vadd.f32 %v393_v4, %v392_v2 }
  0xf9   : > { %v418_v8 = vrot.slane %v417_v6, 2  ;;  %v395_v9 = vrot.slane %v394_v7, 1 }
  0xfb   : > { %v419_v10 = vadd.f32 %v418_v8, %v417_v6  ;;  %v396_v11 = vadd.f32 %v395_v9, %v394_v7 }
  0xfd   : > { %531 = vpush %v396_v11  ;;  %v420_v12 = vrot.slane %v419_v10, 1 }
  0xff   : > { %v421_v13 = vadd.f32 %v420_v12, %v419_v10 }
 0x101   : > { %533 = vpush %v421_v13 }
 0x12e   : > { %s532_s20 = spop %531 }
 0x12f   : > { %s398_s23 = sadd.f32 1.0, %s532_s20 }
 0x132   : > { %s534_s21 = spop %533 }
 0x133   : > { %s423_s22 = sadd.f32 1.0, %s534_s21 }
 0x135   : > { %v424_v14 = vstv %s423_s22 }
 0x136   : > { %570 = vrcp.f32 %v424_v14 }
 0x140   : > { %v571_v15 = vpop.eup %570 }
 0x141   : > { %535 = vpush %v571_v15 }
 0x172   : > { %s536_s24 = spop %535 }
 0x173   : > { %s427_s25 = smul.f32 %s536_s24, %s398_s23 }
 0x175   : > { %s428_s26 = smul.f32 2.0, %s427_s25 }
 0x177   : > { %s429_s30 = ssub.f32 1.0, %s428_s26 }
 0x179   : > { %v430_v16 = vstv %s429_s30 }
 0x17a   : > { %431 = vst [vmem:[%s205_s29] sm:$0xff] %v430_v16 }
 0x17b PF: > { %s12_s11 = sadd.s32 1, %s594_s11   ;;  %s683_s9 = smov %s590_s10 }
 0x17c   : > { %p9_p5 = scmp.ge.s32.totalorder %s12_s11, 4   ;;  %s684_s10 = smov %s686_s12 }
 0x17e   :  { %11 = sbr.rel (!%p9_p5) target bundleno = 2 (0x2), region = 69 }

</bundles_post_ra>
